<compile_context>
chip_gen: v6e
topology: v6e:2x2x1
jax: 0.10.0
libtpu: 0.0.40
codegen_flags: <defaults>
</compile_context>

<pallas_src>
import numpy as np
import jax
import jax.numpy as jnp
from jax.experimental import pallas as pl
from jax.experimental.pallas import tpu as pltpu


# ---------------------------------------------------------------------------
# Pallas kernel: per-pixel zixel -> (dists, one_hot, posterior, mean|logvar)
# operates on a (D, TP) tile: D cluster channels x TP pixels (lane axis).
# ---------------------------------------------------------------------------
def zixel_kernel(z_ref, mu_ref, musq_ref, disp_ref,
                 dists_ref, onehot_ref, post_ref, ml_ref):
    z = z_ref[0]                          # (D, TP)  channels x pixels, f32
    mu_s = mu_ref[...]                    # (D, D)   = -2 * mu (row j = cluster j)
    mu_sq = musq_ref[...]                 # (D, 1)   ||mu_j||^2 (precomputed)
    disp = disp_ref[...]                  # (D, 1)   disparity value per class

    # cluster_distances (1x1 conv): ||z_p - mu_j||^2 = z.z - 2 mu_j.z + mu_j.mu_j
    zm = jnp.dot(mu_s, z, preferred_element_type=jnp.float32)    # (D, TP) = -2 mu.z
    zz = jnp.sum(z * z, axis=0, keepdims=True)                   # (1, TP)
    dists = zz + zm + mu_sq                                      # (D, TP)

    dmin = jnp.min(dists, axis=0, keepdims=True)                 # (1, TP)
    # NOTE: exact float ties set multiple classes (matches a `== min` one-hot,
    # not an argmin scatter); vanishingly unlikely with real data.
    one_hot = (dists == dmin).astype(jnp.float32)                # (D, TP)

    # class_to_reg: disparity of the argmin class per pixel
    mean = jnp.sum(one_hot * disp, axis=0, keepdims=True)        # (1, TP)

    # posterior: softmax over clusters of -0.5*dists, max-shifted so it never
    # underflows (jac and the /dims factor cancel under the normalisation).
    # Exact divide: the kernel is HBM-bound, approx reciprocal is not worth
    # the ~1e-3 error it injects.
    p_un = jnp.exp(0.5 * (dmin - dists))                         # (D, TP)
    den = jnp.sum(p_un, axis=0, keepdims=True)                   # (1, TP)
    post = p_un / den                                            # (D, TP) f32

    # logvar from the full-precision posterior (before the bf16 store cast).
    logvar = jnp.log(jnp.sum((disp - mean) ** 2 * post, axis=0, keepdims=True))

    dists_ref[0] = dists
    onehot_ref[0] = one_hot.astype(onehot_ref.dtype)             # bf16 (exact 0/1)
    post_ref[0] = post.astype(post_ref.dtype)                    # bf16
    ml_ref[0] = jnp.concatenate([mean, logvar], axis=0)          # (2, TP) merged


def _pick_tile_pixels(p, b, requested=None, max_tile=8192):
    """Lane-dense pixel tile.  Full P when it is small/odd, otherwise the
    largest multiple of 128 <= max_tile that divides P.  Guarantees >= 2 grid
    steps (v7x megacore load balance) whenever P allows a split."""
    if requested is not None:
        tp = int(requested)
        assert tp == p or (tp % 128 == 0 and p % tp == 0), (p, tp)
        return tp
    if p % 128 != 0:
        tp = p
    else:
        tp = min(p, (max_tile // 128) * 128)
        while tp >= 128 and p % tp != 0:
            tp -= 128
        if tp < 128:
            tp = p
    # v7x has 2 TensorCores; make sure there is >= 2 grid steps when possible.
    if b * (p // tp) < 2 and p % 256 == 0:
        tp = p // 2
    return tp


def zixel_pallas(z_bdp, mu2d, disp_vals, *, tile_pixels=None):
    """z_bdp: (B, D, P) f32 (NCHW flattened); mu2d: (D, D) rows = cluster
    centers; disp_vals: (D,) disparity value per class."""
    b, d, p = z_bdp.shape
    tp = _pick_tile_pixels(p, b, tile_pixels)

    mu = mu2d.astype(jnp.float32)
    mu_scaled = -2.0 * mu                                        # fold -2 into MXU operand
    mu_sq = jnp.sum(mu * mu, axis=1, keepdims=True)              # (D, 1), hoisted
    disp = disp_vals.reshape(d, 1).astype(jnp.float32)

    grid = (b, p // tp)

    def big_spec():   # (1, D, TP) blocks over (B, D, P) arrays
        return pl.BlockSpec((1, d, tp), lambda bi, pi: (bi, 0, pi))

    out_shape = (
        jax.ShapeDtypeStruct((b, d, p), jnp.float32),    # dists (feeds nll -> f32)
        jax.ShapeDtypeStruct((b, d, p), jnp.bfloat16),   # one_hot (exact 0/1)
        jax.ShapeDtypeStruct((b, d, p), jnp.bfloat16),   # posterior
        jax.ShapeDtypeStruct((b, 2, p), jnp.float32),    # mean | logvar merged
    )
    return pl.pallas_call(
        zixel_kernel,
        out_shape=out_shape,
        grid=grid,
        in_specs=[
            big_spec(),                                   # zixels (B, D, P)
            pl.BlockSpec((d, d), lambda bi, pi: (0, 0)),  # -2*mu     (D, D)
            pl.BlockSpec((d, 1), lambda bi, pi: (0, 0)),  # ||mu||^2  (D, 1)
            pl.BlockSpec((d, 1), lambda bi, pi: (0, 0)),  # disparity (D, 1)
        ],
        out_specs=(
            big_spec(), big_spec(), big_spec(),
            pl.BlockSpec((1, 2, tp), lambda bi, pi: (bi, 0, pi)),
        ),
        compiler_params=pltpu.CompilerParams(
            dimension_semantics=("parallel", "parallel")),
    )(z_bdp, mu_scaled, mu_sq, disp)


# ---------------------------------------------------------------------------
# Invertible.forward plumbing (plain JAX glue, NCHW)
# ---------------------------------------------------------------------------
def invertible_forward(h_views, v_views, i_views, d_views):
    """Reproduces Invertible.forward input plumbing + merge ordering.

    TODO(synk): AIO_HighPerfCouplingBlock (FrEIA affine coupling + act-norm +
    soft permutation) has no reference implementation available here; all
    in/out coupling blocks are treated as identity with zero log-Jacobian.

    With identity couplings, the input permute on the h stream is exactly
    undone by TransformHtoV, and the input permute+flip on the i stream is
    exactly undone by TransformItoD, so each stream reduces to its plain
    (b, n*c, h, w) reshape (self-cancelling transposes/flips stripped -> no
    materialised copies before the channel concat).
    """
    b, n, c, h, w = h_views.shape
    hv = h_views.reshape(b, n * c, h, w)
    vv = v_views.reshape(b, n * c, h, w)
    iv = i_views.reshape(b, n * c, h, w)
    dv = d_views.reshape(b, n * c, h, w)

    # merge_hv, merge_id, merge_hvid -> channel concat, then identity out_net.
    # zixels is a module output, so the concat has to materialise anyway.
    zixels = jnp.concatenate([hv, vv, iv, dv], axis=1)           # (b, dims, h, w)
    jac = jnp.zeros((b,), jnp.float32)                           # log_jac / (dims*h*w)
    return zixels, jac


# ---------------------------------------------------------------------------
# ZixelWrapper.forward
# ---------------------------------------------------------------------------
def zixel_wrapper_forward(params, h_views, v_views, i_views, d_views,
                          disp_min, disp_max, *, tile_pixels=None):
    mu = params["mu"]                                  # (1, dims, dims)
    zixels, jac = invertible_forward(h_views, v_views, i_views, d_views)
    b, dims, h, w = zixels.shape
    steps = dims                                       # 4 * 3 * views (non-cross)

    # NCHW is already (B, D, h*w): no transpose needed for the kernel layout.
    z_bdp = zixels.reshape(b, dims, h * w)
    disp_vals = jnp.linspace(disp_min, disp_max, steps).astype(jnp.float32)

    dists, one_hot, post, ml = zixel_pallas(
        z_bdp, mu[0], disp_vals, tile_pixels=tile_pixels)

    dists = dists.reshape(b, dims, h, w)
    one_hot = one_hot.reshape(b, dims, h, w)           # bf16, exact 0/1
    post = post.reshape(b, dims, h, w)                 # bf16
    mean = ml[:, 0:1, :].reshape(b, 1, h, w)
    logvar = ml[:, 1, :].reshape(b, h, w)              # torch: log(sum(.,1)) -> (b,h,w)

    # nll reconstructed outside the kernel (fused XLA elementwise) to save one
    # full-size HBM output stream.
    nll = (0.5 * dists - jac.reshape(-1, 1, 1, 1)) / float(dims)

    return {
        "zixels": zixels,
        "jac": jac,
        "mu": mu,
        "dists": dists,
        "one_hot": one_hot,
        "nll": nll,
        "posterior": post,
        "mean": mean,
        "logvar": logvar,
    }


# ---------------------------------------------------------------------------
# Pure-JAX reference for correctness check (argmin-independent quantities)
# ---------------------------------------------------------------------------
def reference(zixels, mu, jac, dims):
    mu2 = mu[0]
    mi_mj = jnp.sum(mu2 ** 2, axis=1)[None, :, None, None]
    zi_zj = jnp.sum(zixels ** 2, axis=1, keepdims=True)
    zi_mj = jnp.einsum("bkhw,jk->bjhw", zixels, mu2)
    dists = -2.0 * zi_mj + zi_zj + mi_mj
    nll = (0.5 * dists - jac.reshape(-1, 1, 1, 1)) / float(dims)
    dmin = jnp.min(dists, axis=1, keepdims=True)
    post = jnp.exp(0.5 * (dmin - dists))               # shifted softmax == exp(-nll*d)/sum
    post = post / jnp.sum(post, axis=1, keepdims=True)
    return dists, nll, post


if __name__ == "__main__":
    def run_case(b, n, c, h, w, tile_pixels=None):
        dims = 4 * 3 * n                               # non-cross: 4 * 3 * views
        disp_min, disp_max = -2.0, 2.0

        key = jax.random.PRNGKey(0)
        k1, k2, k3, k4, k5 = jax.random.split(key, 5)
        h_views = jax.random.normal(k1, (b, n, c, h, w), jnp.float32)
        v_views = jax.random.normal(k2, (b, n, c, h, w), jnp.float32)
        i_views = jax.random.normal(k3, (b, n, c, h, w), jnp.float32)
        d_views = jax.random.normal(k4, (b, n, c, h, w), jnp.float32)
        params = {"mu": jax.random.normal(k5, (1, dims, dims), jnp.float32)}

        out = zixel_wrapper_forward(params, h_views, v_views, i_views, d_views,
                                    disp_min, disp_max, tile_pixels=tile_pixels)
        out = jax.block_until_ready(out)

        # --- independent pure-JAX reference: dists / nll / posterior ---
        r_dists, r_nll, r_post = reference(out["zixels"], params["mu"],
                                           out["jac"], dims)
        np.testing.assert_allclose(np.asarray(out["dists"]), np.asarray(r_dists),
                                   rtol=1e-4, atol=1e-4)
        np.testing.assert_allclose(np.asarray(out["nll"]), np.asarray(r_nll),
                                   rtol=1e-4, atol=1e-5)
        # posterior is stored bf16 (<= 2^-9 relative rounding) on top of the
        # f32 in-kernel math -> compare with a bf16-aware tolerance.
        post_f32 = np.asarray(out["posterior"].astype(jnp.float32))
        np.testing.assert_allclose(post_f32, np.asarray(r_post),
                                   rtol=1e-2, atol=1e-3)

        # --- logic checks for the argmin-dependent quantities, derived from
        #     the kernel's own dists/posterior so float-level near-ties cannot
        #     flip the argmin between two independent implementations ---
        d_np = np.asarray(out["dists"])
        oh_np = np.asarray(out["one_hot"].astype(jnp.float32))
        mean_np = np.asarray(out["mean"])
        disp_np = np.asarray(
            jnp.linspace(disp_min, disp_max, dims).astype(jnp.float32)
        ).reshape(1, -1, 1, 1)

        np.testing.assert_array_equal(
            oh_np, (d_np == d_np.min(axis=1, keepdims=True)).astype(np.float32))
        np.testing.assert_allclose(
            mean_np, np.sum(oh_np * disp_np, axis=1, keepdims=True),
            rtol=1e-6, atol=1e-6)
        # kernel logvar uses the f32 posterior; the reference here uses the
        # bf16 posterior output -> loosened absolute tolerance.
        lv_ref = np.log(np.sum((disp_np - mean_np) ** 2 * post_f32, axis=1))
        np.testing.assert_allclose(np.asarray(out["logvar"]), lv_ref,
                                   rtol=1e-3, atol=1e-2)

    # small shape: model_views=1, train_ps=8, model_cross=False  => dims = 12
    run_case(b=2, n=1, c=3, h=8, w=8)
    # larger spatial extent to exercise lane tiling: P = 1024, TP = 256
    # -> grid (2, 4): >= 4 parallel steps for both v7x TCs
    run_case(b=2, n=1, c=3, h=32, w=32, tile_pixels=256)
    # batch 1 exercises the auto-split that keeps >= 2 grid steps for v7x
    run_case(b=1, n=1, c=3, h=16, w=16)

    print("KERNEL_OK")
</pallas_src>

<mosaic_0001>
module attributes {stable_mosaic.version = 11 : i64} {
  func.func @zixel_kernel(%arg0: i32, %arg1: i32, %arg2: memref<1x12x64xf32, #tpu.memory_space<vmem>>, %arg3: memref<12x12xf32, #tpu.memory_space<vmem>>, %arg4: memref<12x1xf32, #tpu.memory_space<vmem>>, %arg5: memref<12x1xf32, #tpu.memory_space<vmem>>, %arg6: memref<1x12x64xf32, #tpu.memory_space<vmem>>, %arg7: memref<1x12x64xbf16, #tpu.memory_space<vmem>>, %arg8: memref<1x12x64xbf16, #tpu.memory_space<vmem>>, %arg9: memref<1x2x64xf32, #tpu.memory_space<vmem>>) attributes {dimension_semantics = [#tpu.dimension_semantics<parallel>, #tpu.dimension_semantics<parallel>], iteration_bounds = array<i64: 2, 1>, scalar_prefetch = 0 : i64, scratch_operands = 0 : i64, tpu.core_type = #tpu.core_type<tc>, window_params = [{transform_indices = @transform_0, window_bounds = array<i64: 1, 12, 64>}, {pipeline_mode = #tpu.pipeline_mode<synchronous>, transform_indices = @transform_1, window_bounds = array<i64: 12, 12>}, {pipeline_mode = #tpu.pipeline_mode<synchronous>, transform_indices = @transform_2, window_bounds = array<i64: 12, 1>}, {pipeline_mode = #tpu.pipeline_mode<synchronous>, transform_indices = @transform_3, window_bounds = array<i64: 12, 1>}, {transform_indices = @transform_4, window_bounds = array<i64: 1, 12, 64>}, {transform_indices = @transform_5, window_bounds = array<i64: 1, 12, 64>}, {transform_indices = @transform_6, window_bounds = array<i64: 1, 12, 64>}, {transform_indices = @transform_7, window_bounds = array<i64: 1, 2, 64>}]} {
    %c0 = arith.constant 0 : index
    %c0_0 = arith.constant 0 : index
    %c0_1 = arith.constant 0 : index
    %0 = vector.load %arg2[%c0, %c0_0, %c0_1] : memref<1x12x64xf32, #tpu.memory_space<vmem>>, vector<1x12x64xf32>
    %1 = vector.shape_cast %0 : vector<1x12x64xf32> to vector<12x64xf32>
    %c0_2 = arith.constant 0 : index
    %c0_3 = arith.constant 0 : index
    %2 = vector.load %arg3[%c0_2, %c0_3] : memref<12x12xf32, #tpu.memory_space<vmem>>, vector<12x12xf32>
    %c0_4 = arith.constant 0 : index
    %c0_5 = arith.constant 0 : index
    %3 = vector.load %arg4[%c0_4, %c0_5] : memref<12x1xf32, #tpu.memory_space<vmem>>, vector<12x1xf32>
    %c0_6 = arith.constant 0 : index
    %c0_7 = arith.constant 0 : index
    %4 = vector.load %arg5[%c0_6, %c0_7] : memref<12x1xf32, #tpu.memory_space<vmem>>, vector<12x1xf32>
    %cst = arith.constant dense<0.000000e+00> : vector<12x64xf32>
    %5 = tpu.matmul %2, %1, %cst {dimension_numbers = #tpu.dot_dimension_numbers<[1], [0], [0], [1], [0, 0, 1, 1], [], []>} : vector<12x12xf32>, vector<12x64xf32>, vector<12x64xf32> -> vector<12x64xf32>
    %6 = arith.mulf %1, %1 : vector<12x64xf32>
    %cst_8 = arith.constant dense<0.000000e+00> : vector<64xf32>
    %7 = vector.multi_reduction <add>, %6, %cst_8 [0] : vector<12x64xf32> to vector<64xf32>
    %8 = vector.shape_cast %7 : vector<64xf32> to vector<1x64xf32>
    %9 = vector.broadcast %8 : vector<1x64xf32> to vector<12x64xf32>
    %10 = arith.addf %9, %5 : vector<12x64xf32>
    %11 = vector.broadcast %3 : vector<12x1xf32> to vector<12x64xf32>
    %12 = arith.addf %10, %11 : vector<12x64xf32>
    %cst_9 = arith.constant dense<0x7F800000> : vector<64xf32>
    %13 = vector.multi_reduction <minimumf>, %12, %cst_9 [0] : vector<12x64xf32> to vector<64xf32>
    %14 = vector.shape_cast %13 : vector<64xf32> to vector<1x64xf32>
    %15 = vector.broadcast %14 : vector<1x64xf32> to vector<12x64xf32>
    %16 = arith.cmpf oeq, %12, %15 : vector<12x64xf32>
    %17 = arith.extui %16 : vector<12x64xi1> to vector<12x64xi32>
    %18 = arith.sitofp %17 : vector<12x64xi32> to vector<12x64xf32>
    %19 = vector.broadcast %4 : vector<12x1xf32> to vector<12x64xf32>
    %20 = arith.mulf %18, %19 : vector<12x64xf32>
    %cst_10 = arith.constant dense<0.000000e+00> : vector<64xf32>
    %21 = vector.multi_reduction <add>, %20, %cst_10 [0] : vector<12x64xf32> to vector<64xf32>
    %22 = vector.shape_cast %21 : vector<64xf32> to vector<1x64xf32>
    %23 = vector.broadcast %14 : vector<1x64xf32> to vector<12x64xf32>
    %24 = arith.subf %23, %12 : vector<12x64xf32>
    %cst_11 = arith.constant 5.000000e-01 : f32
    %25 = vector.broadcast %cst_11 : f32 to vector<12x64xf32>
    %26 = arith.mulf %25, %24 : vector<12x64xf32>
    %27 = math.exp %26 : vector<12x64xf32>
    %cst_12 = arith.constant dense<0.000000e+00> : vector<64xf32>
    %28 = vector.multi_reduction <add>, %27, %cst_12 [0] : vector<12x64xf32> to vector<64xf32>
    %29 = vector.shape_cast %28 : vector<64xf32> to vector<1x64xf32>
    %30 = vector.broadcast %29 : vector<1x64xf32> to vector<12x64xf32>
    %31 = arith.divf %27, %30 : vector<12x64xf32>
    %32 = vector.broadcast %4 : vector<12x1xf32> to vector<12x64xf32>
    %33 = vector.broadcast %22 : vector<1x64xf32> to vector<12x64xf32>
    %34 = arith.subf %32, %33 : vector<12x64xf32>
    %35 = arith.mulf %34, %34 : vector<12x64xf32>
    %36 = arith.mulf %35, %31 : vector<12x64xf32>
    %cst_13 = arith.constant dense<0.000000e+00> : vector<64xf32>
    %37 = vector.multi_reduction <add>, %36, %cst_13 [0] : vector<12x64xf32> to vector<64xf32>
    %38 = vector.shape_cast %37 : vector<64xf32> to vector<1x64xf32>
    %39 = math.log %38 : vector<1x64xf32>
    %c0_14 = arith.constant 0 : index
    %c0_15 = arith.constant 0 : index
    %c0_16 = arith.constant 0 : index
    %40 = vector.load %arg6[%c0_14, %c0_15, %c0_16] : memref<1x12x64xf32, #tpu.memory_space<vmem>>, vector<1x12x64xf32>
    %41 = vector.shape_cast %40 : vector<1x12x64xf32> to vector<12x64xf32>
    %42 = vector.shape_cast %12 : vector<12x64xf32> to vector<1x12x64xf32>
    tpu.vector_store %arg6[%c0_14, %c0_15, %c0_16], %42 {strides = array<i32>} : memref<1x12x64xf32, #tpu.memory_space<vmem>>, vector<1x12x64xf32>,
    %43 = arith.truncf %18 : vector<12x64xf32> to vector<12x64xbf16>
    %c0_17 = arith.constant 0 : index
    %c0_18 = arith.constant 0 : index
    %c0_19 = arith.constant 0 : index
    %44 = vector.load %arg7[%c0_17, %c0_18, %c0_19] : memref<1x12x64xbf16, #tpu.memory_space<vmem>>, vector<1x12x64xbf16>
    %45 = vector.shape_cast %44 : vector<1x12x64xbf16> to vector<12x64xbf16>
    %46 = vector.shape_cast %43 : vector<12x64xbf16> to vector<1x12x64xbf16>
    tpu.vector_store %arg7[%c0_17, %c0_18, %c0_19], %46 {strides = array<i32>} : memref<1x12x64xbf16, #tpu.memory_space<vmem>>, vector<1x12x64xbf16>,
    %47 = arith.truncf %31 : vector<12x64xf32> to vector<12x64xbf16>
    %c0_20 = arith.constant 0 : index
    %c0_21 = arith.constant 0 : index
    %c0_22 = arith.constant 0 : index
    %48 = vector.load %arg8[%c0_20, %c0_21, %c0_22] : memref<1x12x64xbf16, #tpu.memory_space<vmem>>, vector<1x12x64xbf16>
    %49 = vector.shape_cast %48 : vector<1x12x64xbf16> to vector<12x64xbf16>
    %50 = vector.shape_cast %47 : vector<12x64xbf16> to vector<1x12x64xbf16>
    tpu.vector_store %arg8[%c0_20, %c0_21, %c0_22], %50 {strides = array<i32>} : memref<1x12x64xbf16, #tpu.memory_space<vmem>>, vector<1x12x64xbf16>,
    %51 = tpu.concatenate %22, %39 in 0 : vector<1x64xf32>, vector<1x64xf32> -> vector<2x64xf32>
    %c0_23 = arith.constant 0 : index
    %c0_24 = arith.constant 0 : index
    %c0_25 = arith.constant 0 : index
    %52 = vector.load %arg9[%c0_23, %c0_24, %c0_25] : memref<1x2x64xf32, #tpu.memory_space<vmem>>, vector<1x2x64xf32>
    %53 = vector.shape_cast %52 : vector<1x2x64xf32> to vector<2x64xf32>
    %54 = vector.shape_cast %51 : vector<2x64xf32> to vector<1x2x64xf32>
    tpu.vector_store %arg9[%c0_23, %c0_24, %c0_25], %54 {strides = array<i32>} : memref<1x2x64xf32, #tpu.memory_space<vmem>>, vector<1x2x64xf32>,
    return
  }
  func.func @transform_0(%arg0: i32, %arg1: i32) -> (i32, i32, i32) {
    %c0_i32 = arith.constant 0 : i32
    %c0_i32_0 = arith.constant 0 : i32
    return %arg0, %c0_i32, %arg1 : i32, i32, i32
  }
  func.func @transform_1(%arg0: i32, %arg1: i32) -> (i32, i32) {
    %c0_i32 = arith.constant 0 : i32
    %c0_i32_0 = arith.constant 0 : i32
    %c0_i32_1 = arith.constant 0 : i32
    return %c0_i32, %c0_i32_0 : i32, i32
  }
  func.func @transform_2(%arg0: i32, %arg1: i32) -> (i32, i32) {
    %c0_i32 = arith.constant 0 : i32
    %c0_i32_0 = arith.constant 0 : i32
    %c0_i32_1 = arith.constant 0 : i32
    return %c0_i32, %c0_i32_0 : i32, i32
  }
  func.func @transform_3(%arg0: i32, %arg1: i32) -> (i32, i32) {
    %c0_i32 = arith.constant 0 : i32
    %c0_i32_0 = arith.constant 0 : i32
    %c0_i32_1 = arith.constant 0 : i32
    return %c0_i32, %c0_i32_0 : i32, i32
  }
  func.func @transform_4(%arg0: i32, %arg1: i32) -> (i32, i32, i32) {
    %c0_i32 = arith.constant 0 : i32
    %c0_i32_0 = arith.constant 0 : i32
    return %arg0, %c0_i32, %arg1 : i32, i32, i32
  }
  func.func @transform_5(%arg0: i32, %arg1: i32) -> (i32, i32, i32) {
    %c0_i32 = arith.constant 0 : i32
    %c0_i32_0 = arith.constant 0 : i32
    return %arg0, %c0_i32, %arg1 : i32, i32, i32
  }
  func.func @transform_6(%arg0: i32, %arg1: i32) -> (i32, i32, i32) {
    %c0_i32 = arith.constant 0 : i32
    %c0_i32_0 = arith.constant 0 : i32
    return %arg0, %c0_i32, %arg1 : i32, i32, i32
  }
  func.func @transform_7(%arg0: i32, %arg1: i32) -> (i32, i32, i32) {
    %c0_i32 = arith.constant 0 : i32
    %c0_i32_0 = arith.constant 0 : i32
    return %arg0, %c0_i32, %arg1 : i32, i32, i32
  }
}

</mosaic_0001>

<bundles_post_ra>
// kernel: tpu_custom_call.1
= control target key start
LH: loop header
LB: loop body
LE: loop exit
PB: predicated region body
PF: predicated region fallthrough
CT: control target
= control target key end

     0   :  { %13 = vsyncpa [#allocation3], 0  ;;  %s1210_s0 = inlined_call_operand.vmem [shape: f32[2,12,64], index: 0, kind: input, shape index: {}]   ;;  %s1211_s1 = inlined_call_operand.vmem [shape: f32[12,12], index: 1, kind: input, shape index: {}]   ;;  %s1212_s2 = inlined_call_operand.vmem [shape: f32[12,1], index: 2, kind: input, shape index: {}]   ;;  %s1213_s3 = inlined_call_operand.vmem [shape: f32[12,1], index: 3, kind: input, shape index: {}]   ;;  %s1214_s4 = inlined_call_operand.vmem [shape: f32[2,12,64], index: 4, kind: output, shape index: {0}]   ;;  %s1215_s5 = inlined_call_operand.vmem [shape: bf16[2,12,64], index: 5, kind: output, shape index: {1}]   ;;  %s1216_s6 = inlined_call_operand.vmem [shape: bf16[2,12,64], index: 6, kind: output, shape index: {2}]   ;;  %s1217_s7 = inlined_call_operand.hbm [shape: f32[2,2,64], index: 7, kind: output, shape index: {3}]  }
   0x1   :  { %15 = vsyncpa [#allocation3 + $0x1], 0  ;;  %s1047_s24 = smov 0   ;;  %s1049_s25 = smov 0  }
   0x2   :  { %s1051_s26 = smov 0   ;;  %s1053_s27 = smov 0  }
   0x3   :  { %s1055_s28 = smov 0   ;;  %s1057_s29 = smov 0  }
   0x4 LB: > { %s813_s30 = sadd.s32 4294967295, %s1002_s29   ;;  %s814_s8 = sadd.s32 4294967294, %s1002_s29   ;;  %s1002_s29 = sphi %s1057_s29, %s21_s29   ;;  %s998_s28 = sphi %s1055_s28, %s1224_s28   ;;  %s994_s27 = sphi %s1053_s27, %s1223_s27   ;;  %s990_s26 = sphi %s1051_s26, %s1222_s26   ;;  %s986_s25 = sphi %s1049_s25, %s1221_s25   ;;  %s982_s24 = sphi %s1047_s24, %s1220_s24  }
   0x5   : > { %s33_s9 = sadd.s32 1, %s998_s28  ;;  %s217_s10 = sadd.s32 1, %s990_s26 }
   0x6   : > { %p35_p0 = scmp.ge.s32.totalorder %s33_s9, 2  ;;  %p227_p1 = scmp.ne.s32.totalorder %s990_s26, %s986_s25 }
   0x7   : > { %p228_p2 = scmp.eq.s32.totalorder %s813_s30, 1  ;;  %p233_p3 = scmp.ne.s32.totalorder %s986_s25, %s982_s24 }
   0x8   : > { %s1226_s9 = smov (%p35_p0, %s33_s9), 0  ;;  %p234_p5 = scmp.eq.s32.totalorder %s814_s8, 1 }
   0x9   : > { %p1087_p4 = por %p228_p2, %p227_p1  ;;  %s212_s12 = ssub.s32 %s998_s28, %s1226_s9 }
   0xa   : > { %p817_p6 = scmp.ge.s32.totalorder %s1002_s29, 1  ;;  %p215_p7 = scmp.eq.s32.totalorder %s212_s12, 0 }
   0xb   : > { %p1094_p8 = por %p234_p5, %p233_p3  ;;  %p272_p9 = scmp.lt.s32.totalorder %s1002_s29, 3 }
   0xc   : > { %s1100_s14 = scalar_select %p215_p7, %s990_s26, %s217_s10  }
   0xd   : > { %p273_p10 = pnand %p817_p6, %p272_p9 }
   0xe   : > { %p331_p11 = scmp.lt.s32.totalorder (!%p273_p10), %s994_s27, 1  ;;  %s837_s18 = sshll.u32 (!%p273_p10), %s994_s27, 5 }
   0xf   : > { %276 = sbr.rel (%p273_p10) target bundleno = 342 (0x156), region = 36  ;;  %s1169_s30 = scalar_lea.hbm (!%p273_p10), %s1217_s7, %s837_s18 }
  0x14   : > { %v365_v0 = vld [vmem:[%s1211_s1] sm:$0xff]  ;;  %vm371_vm0 = vcmask 97280   ;;  %s1111_s19 = scalar_select %p331_p11, %s994_s27, 1  ;;  %v1004_v2 = vmov 0   ;;  %vm378_vm1 = vcmask 1043456   ;;  %vm461_vm2 = vcmask 519168  }
  0x15   : > { %856 = vmatprep.mubr.msk.f32.mxu0 %vm371_vm0, %v365_v0  ;;  %v367_v1 = vld [vmem:[%s1212_s2] sm:$0xff]  ;;  %916 = vset.pattern.permute.xlu0 %v1004_v2  ;;  %v368_v4 = vld [vmem:[%s1212_s2 + $0x8] sm:$0xf]  ;;  %vm459_vm3 = vcmask 523264   ;;  %v1005_v39 = vmov 0.0   ;;  %vm568_vm6 = vcmask 517120  }
  0x16   : > { %917 = vset.pattern.permute.xlu1 %v1004_v2  ;;  %v369_v3 = vld [vmem:[%s1213_s3] sm:$0xff]  ;;  %474 = vperm.xlu0 %916, %v367_v1   ;;  %s840_s22 = sshll.u32 %s1111_s19, 4  ;;  %v370_v5 = vld [vmem:[%s1213_s3 + $0x8] sm:$0xf]  ;;  %vm580_vm7 = vcmask 1040384   ;;  %s1006_s27 = smov [#allocation2]  }
  0x17   : > { %501 = vperm.xlu1 %917, %v369_v3   ;;  %s338_s12 = scalar_lea.vmem %s1210_s0, %s840_s22  ;;  %v366_v10 = vld [vmem:[%s1211_s1 + $0x8] sm:$0xf]  ;;  %s346_s23 = scalar_lea.vmem %s1214_s4, %s840_s22 }
  0x18   : > { %v364_v6 = vld [vmem:[%s338_s12 + $0x8] sm:$0xf]  ;;  %v363_v7 = vld [vmem:[%s338_s12] sm:$0xff]  ;;  %s842_s22 = sshll.u32 %s1111_s19, 3  ;;  %s328_s19 = sand.u32 1, %s986_s25  }
  0x19   : > { %852 = vmatprep.subr.msk.mxu0 %vm378_vm1, %v364_v6  ;;  %v458_v8 = vmul.f32 %v364_v6, %v364_v6  ;;  %v457_v9 = vmul.f32 %v363_v7, %v363_v7  ;;  %s354_s10 = scalar_lea.vmem %s1215_s5, %s842_s22  ;;  %s362_s16 = scalar_lea.vmem %s1216_s6, %s842_s22 }
  0x1a   : > { %479 = vperm.xlu0 %916, %v368_v4   ;;  %853 = vmatpush3.msk.msra.mxu0 %vm378_vm1, %v364_v6  ;;  %s818_s17 = sshll.u32 %s328_s19, 1  ;;  %s608_s8 = scalar_lea.sflag [#allocation3], %s328_s19 }
  0x1b   : > { %506 = vperm.xlu1 %917, %v370_v5   ;;  %v462_v11 = vsel %vm461_vm2, %v458_v8, 0.0  ;;  %854 = vmatprep.subr.mxu0 %v363_v7  ;;  %v460_v12 = vsel %vm459_vm3, %v457_v9, 0.0  ;;  %s330_s20 = scalar_lea.vmem [#allocation2], %s818_s17  ;;  %s930_s12 = sshll.u32 %s1006_s27, 4  ;;  %s931_s12 = int_to_ptr.vmem [resolvable:$false] %s930_s12 }
  0x1c   : > { %v463_v13 = vadd.f32 %v462_v11, %v460_v12  ;;  %855 = vmatpush3.msra.mxu0 %v363_v7  ;;  %s631_s21 = sshll.u32 %s330_s20, 4  ;;  %s932_s15 = scalar_lea.vmem %s931_s12, 64  ;;  %s632_s21 = int_to_ptr.vmem [resolvable:$true] %s631_s21 }
  0x1d   : > { %857 = vmatmul.mubr.msk.f32.vlgmr.msra.gmra.mxu0 %vm371_vm0, %v366_v10  ;;  %p933_p1 = scmp.lt.s32.totalorder %s632_s21, %s931_s12 }
  0x1e   : > { %v464_v14 = vrot.slane %v463_v13, 4 }
  0x20   : > { %v465_v15 = vadd.f32 %v464_v14, %v463_v13 }
  0x22   : > { %v466_v16 = vrot.slane %v465_v15, 2 }
  0x24   : > { %v467_v17 = vadd.f32 %v466_v16, %v465_v15 }
  0x26   : > { %v468_v18 = vrot.slane %v467_v17, 1 }
  0x28   : > { %v469_v20 = vadd.f32 %v468_v18, %v467_v17 }
  0x91   : > { %v475_v19 = vpop.permute.xlu0 %474 }
  0x92   : > { %v502_v43 = vpop.permute.xlu1 %501 }
  0x95   : > { %v480_v23 = vpop.permute.xlu0 %479 }
  0x96   : > { %v507_v49 = vpop.permute.xlu1 %506 }
  0xdd   : > { %v858_v21 = vpop.f32.mrf.mxu0 }
  0xde   : > { %v471_v22 = vadd.f32 %v858_v21, %v469_v20 }
  0xdf   : > { %v448_v24 = vpop.f32.mrf.mxu0 }
  0xe0   : > { %v483_v25 = vadd.f32 %v480_v23, %v471_v22  ;;  %v470_v26 = vadd.f32 %v469_v20, %v448_v24 }
  0xe2   : > { %558 = vst.msk [vmem:[%s346_s23 + $0x8] sm:$0xf] %vm461_vm2, %v483_v25  ;;  %v482_v27 = vadd.f32 %v475_v19, %v470_v26  ;;  %v485_v28 = vsel %vm461_vm2, %v483_v25, inf }
  0xe4   : > { %v484_v29 = vsel %vm459_vm3, %v482_v27, inf  ;;  %557 = vst.msk [vmem:[%s346_s23] sm:$0xff] %vm459_vm3, %v482_v27 }
  0xe5   : > { %v486_v30 = vmin.f32 %v484_v29, %v485_v28 }
  0xe7   : > { %v487_v31 = vrot.slane %v486_v30, 4 }
  0xe9   : > { %v488_v32 = vmin.f32 %v486_v30, %v487_v31 }
  0xeb   : > { %v489_v33 = vrot.slane %v488_v32, 2 }
  0xed   : > { %v490_v34 = vmin.f32 %v488_v32, %v489_v33 }
  0xef   : > { %v491_v35 = vrot.slane %v490_v34, 1 }
  0xf1   : > { %v492_v36 = vmin.f32 %v490_v34, %v491_v35 }
  0xf3   : > { %v520_v37 = vsub.f32 %v492_v36, %v482_v27  ;;  %vm493_vm4 = vcmp.eq.f32.partialorder %v482_v27, %v492_v36  ;;  %vm494_vm5 = vcmp.eq.f32.partialorder %v483_v25, %v492_v36  ;;  %v521_v38 = vsub.f32 %v492_v36, %v483_v25 }
  0xf4   : > { %v830_v40 = vsel %vm493_vm4, 1.0, %v1005_v39  ;;  %v831_v41 = vsel %vm494_vm5, 1.0, %v1005_v39 }
  0xf5   : > { %v522_v42 = vmul.f32 0.5, %v520_v37  ;;  %v844_v44 = vpack.c.bf16 %v830_v40, %v830_v40  ;;  %v523_v45 = vmul.f32 0.5, %v521_v38  ;;  %v845_v46 = vpack.c.bf16 %v831_v41, %v831_v41 }
  0xf6   : > { %v509_v50 = vmul.f32 %v830_v40, %v502_v43  ;;  %v510_v51 = vmul.f32 %v831_v41, %v507_v49 }
  0xf7   : > { %v524_v47 = vmul.f32 1.442695, %v522_v42  ;;  %567 = vst.msk [vmem:[%s354_s10] sm:$0xf] %vm461_vm2, %v844_v44  ;;  %v526_v48 = vmul.f32 1.442695, %v523_v45 }
  0xf8   : > { %569 = vst.msk [vmem:[%s354_s10 + $0x4] sm:$0x3] %vm568_vm6, %v845_v46  ;;  %v511_v52 = vsel %vm459_vm3, %v509_v50, 0.0  ;;  %v512_v53 = vsel %vm461_vm2, %v510_v51, 0.0  ;;  %s926_s10 = scalar_lea.vmem %s632_s21, 32 }
  0xf9   : > { %918 = vpow2.f32 %v524_v47  ;;  %v513_v54 = vadd.f32 %v512_v53, %v511_v52  ;;  %p927_p12 = scmp.ne.s32.totalorder %s632_s21, %s926_s10  ;;  %p934_p2 = scmp.lt.s32.totalorder %s932_s15, %s926_s10 }
  0xfa   : > { %920 = vpow2.f32 %v526_v48 }
  0xfb   : > { %v514_v59 = vrot.slane %v513_v54, 4  ;;  %p928_p13 = pnand %p927_p12, %p1087_p4  ;;  %p935_p3 = por %p934_p2, %p933_p1 }
  0xfd   : > { %v515_v62 = vadd.f32 %v514_v59, %v513_v54  ;;  %p929_p0 = pneg %p928_p13 }
  0xff   : > { %v516_v1 = vrot.slane %v515_v62, 2  ;;  %p936_p5 = pnand %p935_p3, %p929_p0 }
 0x101   : > { %v517_v4 = vadd.f32 %v516_v1, %v515_v62 }
 0x103   : > { %v518_v6 = vrot.slane %v517_v4, 1 }
 0x105   : > { %v519_v7 = vadd.f32 %v518_v6, %v517_v4 }
 0x106   : > { %v919_v55 = vpop.eup %918 }
 0x107   : > { %v921_v56 = vpop.eup %920  ;;  %v528_v57 = vsel %vm459_vm3, %v919_v55, 0.0  ;;  %v540_v8 = vsub.f32 %v502_v43, %v519_v7  ;;  %v541_v9 = vsub.f32 %v507_v49, %v519_v7 }
 0x108   : > { %v529_v58 = vsel %vm461_vm2, %v921_v56, 0.0 }
 0x109   : > { %v530_v60 = vadd.f32 %v529_v58, %v528_v57  ;;  %v542_v13 = vmul.f32 %v540_v8, %v540_v8  ;;  %v543_v14 = vmul.f32 %v541_v9, %v541_v9 }
 0x10b   : > { %v531_v61 = vrot.slane %v530_v60, 4 }
 0x10d   : > { %v532_v63 = vadd.f32 %v531_v61, %v530_v60 }
 0x10f   : > { %v533_v0 = vrot.slane %v532_v63, 2 }
 0x111   : > { %v534_v2 = vadd.f32 %v533_v0, %v532_v63 }
 0x113   : > { %v535_v3 = vrot.slane %v534_v2, 1 }
 0x115   : > { %v536_v5 = vadd.f32 %v535_v3, %v534_v2 }
 0x117   : > { %922 = vrcp.f32 %v536_v5 }
 0x124   : > { %v923_v10 = vpop.eup %922 }
 0x125   : > { %v538_v11 = vmul.f32 %v923_v10, %v919_v55  ;;  %v539_v12 = vmul.f32 %v923_v10, %v921_v56 }
 0x127   : > { %v544_v15 = vmul.f32 %v542_v13, %v538_v11  ;;  %v545_v16 = vmul.f32 %v543_v14, %v539_v12  ;;  %v846_v17 = vpack.c.bf16 %v538_v11, %v538_v11  ;;  %v847_v18 = vpack.c.bf16 %v539_v12, %v539_v12 }
 0x129   : > { %v546_v19 = vsel %vm459_vm3, %v544_v15, 0.0  ;;  %v547_v20 = vsel %vm461_vm2, %v545_v16, 0.0  ;;  %578 = vst.msk [vmem:[%s362_s16] sm:$0xf] %vm461_vm2, %v846_v17 }
 0x12a   : > { %579 = vst.msk [vmem:[%s362_s16 + $0x4] sm:$0x3] %vm568_vm6, %v847_v18  ;;  %v548_v21 = vadd.f32 %v547_v20, %v546_v19 }
 0x12c   : > { %v549_v22 = vrot.slane %v548_v21, 4 }
 0x12e   : > { %v550_v23 = vadd.f32 %v549_v22, %v548_v21 }
 0x130   : > { %v551_v24 = vrot.slane %v550_v23, 2 }
 0x132   : > { %v552_v25 = vadd.f32 %v551_v24, %v550_v23 }
 0x134   : > { %v553_v26 = vrot.slane %v552_v25, 1 }
 0x136   : > { %v554_v27 = vadd.f32 %v553_v26, %v552_v25 }
 0x138   : > { %924 = vlog2.f32 %v554_v27 }
 0x145   : > { %v925_v28 = vpop.eup %924 }
 0x146   : > { %v556_v29 = vmul.f32 0.6931472, %v925_v28 }
 0x148   : > { %v581_v30 = vsel %vm580_vm7, %v519_v7, %v556_v29 }
 0x149   : > { %582 = vst.msk [vmem:[%s330_s20] sm:$0x3] %vm568_vm6, %v581_v30 }
 0x14a   : > { %939 = shalt.err (!%p936_p5)
}
 0x14b   : > { %s940_s16 = scalar_lea.hbm %s1169_s30, 32  ;;  %s944_s18 = scalar_lea.hbm %s1217_s7, 64 }
 0x14c   : > { %p941_p6 = scmp.ne.s32.totalorder %s1169_s30, %s940_s16  ;;  %p945_p10 = scmp.lt.s32.totalorder %s1169_s30, %s1217_s7 }
 0x14d   : > { %p946_p11 = scmp.lt.s32.totalorder %s944_s18, %s940_s16 }
 0x14e   : > { %p942_p7 = pnand %p941_p6, %p1087_p4 }
 0x14f   : > { %p947_p12 = por %p946_p11, %p945_p10 }
 0x150   : > { %p943_p9 = pneg %p942_p7 }
 0x152   : > { %p948_p13 = pnand %p947_p12, %p943_p9 }
 0x154   : > { %951 = shalt.err (!%p948_p13)
}
 0x155   : > { %859 = dma.vmem_to_hbm [thread:$0]  (%p1087_p4), %s632_s21, 32, %s1169_s30, %s608_s8  }
 0x156 PF: > { %p865_p0 = scmp.ge.s32.totalorder %s1002_s29, 2  ;;  %s676_s22 = sand.u32 1, %s982_s24  }
 0x157   : > { %s677_s10 = scalar_lea.sflag [#allocation3], %s676_s22 }
 0x158   : > { %p862_p1 = pnand %p865_p0, %p1094_p8 }
 0x15a   : > { %p863_p2 = pneg %p862_p1 }
 0x15c   : > { %977 = dma.done.wait (%p863_p2), %s677_s10, 32  }
 0x15d   : > { %979 = vsyncadd (%p863_p2), %s677_s10, 4294967264  ;;  %s21_s29 = sadd.s32 1, %s1002_s29   ;;  %s1220_s24 = smov %s986_s25 }
 0x15e   : > { %p18_p3 = scmp.ge.s32.totalorder %s21_s29, 4   ;;  %s1221_s25 = smov %s990_s26 }
 0x15f   : > { %s1222_s26 = smov %s1100_s14  ;;  %s1223_s27 = smov %s998_s28 }
 0x160   : > { %s1224_s28 = smov %s1226_s9  ;;  %20 = sbr.rel (!%p18_p3) target bundleno = 4 (0x4), region = 107 }
 0x165   :  { %682 = vsyncpa [#allocation3], 1 }
 0x166   :  { %684 = vsyncpa [#allocation3 + $0x1], 1 }

</bundles_post_ra>
